<compile_context>
chip_gen: v7x
topology: tpu7x:2x2x1
jax: 0.10.0
libtpu: 0.0.40
codegen_flags: <defaults>
</compile_context>

<pallas_src>
import jax
import jax.numpy as jnp
from jax.experimental import pallas as pl
from jax.experimental.pallas import tpu as pltpu

INPUT_SIZE = 784
HIDDEN1 = 200
HIDDEN2 = 150
OUTPUT = 10

# Lane-aligned (multiple-of-128) padded dims seen by the kernel.
H1_PAD = 256
H2_PAD = 256
OUT_PAD = 128


def mlp_kernel(x_ref, w1_ref, b1_ref, w2_ref, b2_ref, w3_ref, b3_ref, o_ref):
    # x arrives as f32 straight from the caller's HBM buffer; cast to bf16
    # in-VMEM (avoids an extra wrapper-side HBM pass over x).
    x = x_ref[...].astype(jnp.bfloat16)

    # Layer 1: Linear + ReLU. bf16 operands, f32 MXU accumulation.
    h1 = jnp.dot(x, w1_ref[...], preferred_element_type=jnp.float32)
    h1 = jnp.maximum(h1 + b1_ref[...], 0.0)

    # Layer 2: Linear + ReLU (re-cast activation to bf16 for native MXU rate).
    h2 = jnp.dot(h1.astype(jnp.bfloat16), w2_ref[...],
                 preferred_element_type=jnp.float32)
    h2 = jnp.maximum(h2 + b2_ref[...], 0.0)

    # Output layer: Linear (no activation). Lane-dense 128-wide bf16 store
    # (f32 accumulate + bias, rounded only at the final store).
    out = jnp.dot(h2.astype(jnp.bfloat16), w3_ref[...],
                  preferred_element_type=jnp.float32)
    o_ref[...] = (out + b3_ref[...]).astype(o_ref.dtype)


def _round_up(x, m):
    return ((x + m - 1) // m) * m


def _pad2(a, rows, cols):
    return jnp.pad(a, ((0, rows - a.shape[0]), (0, cols - a.shape[1])))


def prepare_params(w1, b1, w2, b2, w3, b3):
    """Pad + cast parameters ONCE (hoisted out of the per-call path).

    Weights are in (in, out) layout.  Padded rows/columns and padded bias
    lanes are zero, so ReLU of padded hidden lanes stays 0 and results are
    unchanged.
    """
    return (
        _pad2(w1, INPUT_SIZE, H1_PAD).astype(jnp.bfloat16),
        _pad2(b1.reshape(1, -1), 1, H1_PAD).astype(jnp.float32),
        _pad2(w2, H1_PAD, H2_PAD).astype(jnp.bfloat16),
        _pad2(b2.reshape(1, -1), 1, H2_PAD).astype(jnp.float32),
        _pad2(w3, H2_PAD, OUT_PAD).astype(jnp.bfloat16),
        _pad2(b3.reshape(1, -1), 1, OUT_PAD).astype(jnp.float32),
    )


def _choose_tm(batch):
    """Pick the batch tile size.

    Large batches: tiles up to 1024 rows amortize the per-grid-step pipeline
    overhead while keeping >= 2 tiles so v7x's two TensorCores both get work
    via the "parallel" grid axis; 1024 rows (~13 MiB live VMEM) also fits
    comfortably on v5e.  Small batches: one tile with a 32-row floor so the
    bf16 intermediates aren't half-masked in their sublane packing.
    """
    if batch >= 512:
        return min(1024, _round_up((batch + 1) // 2, 256))
    return max(32, _round_up(batch, 32))


def mlp_forward(x, params):
    """x: (B, 784) float32; params: output of prepare_params()."""
    w1p, b1p, w2p, b2p, w3p, b3p = params
    B, K = x.shape

    TM = _choose_tm(B)
    # Partial tail tile: rows past B are garbage but each matmul output row
    # depends only on its own input row, and out-of-bounds output rows are
    # masked on the write (and never read back).
    n_tiles = pl.cdiv(B, TM)

    # Weights & biases use a constant index_map so they are DMA'd once and
    # stay VMEM-resident across the whole batch grid.
    resident = lambda a: pl.BlockSpec(a.shape, lambda i: (0,) * a.ndim)

    cost = pl.CostEstimate(
        flops=2 * B * (INPUT_SIZE * HIDDEN1 + HIDDEN1 * HIDDEN2
                       + HIDDEN2 * OUTPUT),
        transcendentals=0,
        bytes_accessed=(x.size * 4                                   # f32 x in
                        + (w1p.size + w2p.size + w3p.size) * 2       # bf16 weights
                        + (b1p.size + b2p.size + b3p.size) * 4       # f32 biases
                        + B * OUT_PAD * 2),                          # bf16 out
    )

    out_padded = pl.pallas_call(
        mlp_kernel,
        out_shape=jax.ShapeDtypeStruct((B, OUT_PAD), jnp.bfloat16),
        grid=(n_tiles,),
        in_specs=[
            pl.BlockSpec((TM, K), lambda i: (i, 0)),
            resident(w1p), resident(b1p),
            resident(w2p), resident(b2p),
            resident(w3p), resident(b3p),
        ],
        out_specs=pl.BlockSpec((TM, OUT_PAD), lambda i: (i, 0)),
        compiler_params=pltpu.CompilerParams(
            dimension_semantics=("parallel",),
            vmem_limit_bytes=32 * 1024 * 1024),
        cost_estimate=cost,
    )(x, w1p, b1p, w2p, b2p, w3p, b3p)

    # Strip the lane padding of the 10-wide output; upcast to f32 so the
    # external dtype matches the PyTorch module (accumulation was f32; only
    # the final store was bf16 to halve the padded writeback bytes).
    return out_padded[:, :OUTPUT].astype(jnp.float32)


def init_linear(key, fan_in, fan_out):
    # Deterministic init mimicking PyTorch nn.Linear (uniform +/- 1/sqrt(fan_in)).
    kw, kb = jax.random.split(key)
    bound = 1.0 / jnp.sqrt(fan_in)
    # Stored already transposed: (in, out) so the kernel does x @ W.
    w = jax.random.uniform(kw, (fan_in, fan_out), jnp.float32, -bound, bound)
    b = jax.random.uniform(kb, (fan_out,), jnp.float32, -bound, bound)
    return w, b


if __name__ == "__main__":
    key = jax.random.PRNGKey(0)
    kx, k1, k2, k3 = jax.random.split(key, 4)

    batch = 8
    x = jax.random.normal(kx, (batch, INPUT_SIZE), jnp.float32)

    w1, b1 = init_linear(k1, INPUT_SIZE, HIDDEN1)
    w2, b2 = init_linear(k2, HIDDEN1, HIDDEN2)
    w3, b3 = init_linear(k3, HIDDEN2, OUTPUT)

    # Pad/cast params once, outside the per-call (jitted) path.
    params = prepare_params(w1, b1, w2, b2, w3, b3)

    fwd = jax.jit(mlp_forward)
    out = jax.block_until_ready(fwd(x, params))
    assert out.shape == (batch, OUTPUT)
    assert out.dtype == jnp.float32

    # Reference 1: same bf16-operand / f32-accumulate / bf16-store math.
    xb = x.astype(jnp.bfloat16)
    h = jnp.maximum(jnp.dot(xb, w1.astype(jnp.bfloat16),
                            preferred_element_type=jnp.float32) + b1, 0.0)
    h = jnp.maximum(jnp.dot(h.astype(jnp.bfloat16), w2.astype(jnp.bfloat16),
                            preferred_element_type=jnp.float32) + b2, 0.0)
    ref_bf16 = jnp.dot(h.astype(jnp.bfloat16), w3.astype(jnp.bfloat16),
                       preferred_element_type=jnp.float32) + b3
    ref_bf16 = ref_bf16.astype(jnp.bfloat16).astype(jnp.float32)
    assert jnp.allclose(out, ref_bf16, atol=2e-2, rtol=2e-2)

    # Reference 2: full f32 forward (PyTorch semantics), looser tol for bf16.
    ref_f32 = jnp.maximum(x @ w1 + b1, 0.0)
    ref_f32 = jnp.maximum(ref_f32 @ w2 + b2, 0.0)
    ref_f32 = ref_f32 @ w3 + b3
    assert jnp.allclose(out, ref_f32, atol=5e-2, rtol=5e-2)

    print("KERNEL_OK")
</pallas_src>

<mosaic_0001>
module attributes {stable_mosaic.version = 11 : i64} {
  func.func @mlp_kernel(%arg0: i32, %arg1: memref<32x784xf32, #tpu.memory_space<vmem>>, %arg2: memref<784x256xbf16, #tpu.memory_space<vmem>>, %arg3: memref<1x256xf32, #tpu.memory_space<vmem>>, %arg4: memref<256x256xbf16, #tpu.memory_space<vmem>>, %arg5: memref<1x256xf32, #tpu.memory_space<vmem>>, %arg6: memref<256x128xbf16, #tpu.memory_space<vmem>>, %arg7: memref<1x128xf32, #tpu.memory_space<vmem>>, %arg8: memref<32x128xbf16, #tpu.memory_space<vmem>>) attributes {dimension_semantics = [#tpu.dimension_semantics<parallel>], iteration_bounds = array<i64: 1>, scalar_prefetch = 0 : i64, scratch_operands = 0 : i64, tpu.core_type = #tpu.core_type<tc>, window_params = [{transform_indices = @transform_0, window_bounds = array<i64: 32, 784>}, {pipeline_mode = #tpu.pipeline_mode<synchronous>, transform_indices = @transform_1, window_bounds = array<i64: 784, 256>}, {pipeline_mode = #tpu.pipeline_mode<synchronous>, transform_indices = @transform_2, window_bounds = array<i64: 1, 256>}, {pipeline_mode = #tpu.pipeline_mode<synchronous>, transform_indices = @transform_3, window_bounds = array<i64: 256, 256>}, {pipeline_mode = #tpu.pipeline_mode<synchronous>, transform_indices = @transform_4, window_bounds = array<i64: 1, 256>}, {pipeline_mode = #tpu.pipeline_mode<synchronous>, transform_indices = @transform_5, window_bounds = array<i64: 256, 128>}, {pipeline_mode = #tpu.pipeline_mode<synchronous>, transform_indices = @transform_6, window_bounds = array<i64: 1, 128>}, {transform_indices = @transform_7, window_bounds = array<i64: 32, 128>}]} {
    %c0 = arith.constant 0 : index
    %c0_0 = arith.constant 0 : index
    %0 = vector.load %arg1[%c0, %c0_0] : memref<32x784xf32, #tpu.memory_space<vmem>>, vector<32x784xf32>
    %1 = arith.truncf %0 : vector<32x784xf32> to vector<32x784xbf16>
    %c0_1 = arith.constant 0 : index
    %c0_2 = arith.constant 0 : index
    %2 = vector.load %arg2[%c0_1, %c0_2] : memref<784x256xbf16, #tpu.memory_space<vmem>>, vector<784x256xbf16>
    %cst = arith.constant dense<0.000000e+00> : vector<32x256xf32>
    %3 = tpu.matmul %1, %2, %cst {dimension_numbers = #tpu.dot_dimension_numbers<[1], [0], [0], [1], [0, 0, 1, 1], [], []>} : vector<32x784xbf16>, vector<784x256xbf16>, vector<32x256xf32> -> vector<32x256xf32>
    %c0_3 = arith.constant 0 : index
    %c0_4 = arith.constant 0 : index
    %4 = vector.load %arg3[%c0_3, %c0_4] : memref<1x256xf32, #tpu.memory_space<vmem>>, vector<1x256xf32>
    %5 = vector.broadcast %4 : vector<1x256xf32> to vector<32x256xf32>
    %6 = arith.addf %3, %5 : vector<32x256xf32>
    %cst_5 = arith.constant 0.000000e+00 : f32
    %7 = vector.broadcast %cst_5 : f32 to vector<32x256xf32>
    %8 = arith.maximumf %6, %7 : vector<32x256xf32>
    %9 = arith.truncf %8 : vector<32x256xf32> to vector<32x256xbf16>
    %c0_6 = arith.constant 0 : index
    %c0_7 = arith.constant 0 : index
    %10 = vector.load %arg4[%c0_6, %c0_7] : memref<256x256xbf16, #tpu.memory_space<vmem>>, vector<256x256xbf16>
    %cst_8 = arith.constant dense<0.000000e+00> : vector<32x256xf32>
    %11 = tpu.matmul %9, %10, %cst_8 {dimension_numbers = #tpu.dot_dimension_numbers<[1], [0], [0], [1], [0, 0, 1, 1], [], []>} : vector<32x256xbf16>, vector<256x256xbf16>, vector<32x256xf32> -> vector<32x256xf32>
    %c0_9 = arith.constant 0 : index
    %c0_10 = arith.constant 0 : index
    %12 = vector.load %arg5[%c0_9, %c0_10] : memref<1x256xf32, #tpu.memory_space<vmem>>, vector<1x256xf32>
    %13 = vector.broadcast %12 : vector<1x256xf32> to vector<32x256xf32>
    %14 = arith.addf %11, %13 : vector<32x256xf32>
    %cst_11 = arith.constant 0.000000e+00 : f32
    %15 = vector.broadcast %cst_11 : f32 to vector<32x256xf32>
    %16 = arith.maximumf %14, %15 : vector<32x256xf32>
    %17 = arith.truncf %16 : vector<32x256xf32> to vector<32x256xbf16>
    %c0_12 = arith.constant 0 : index
    %c0_13 = arith.constant 0 : index
    %18 = vector.load %arg6[%c0_12, %c0_13] : memref<256x128xbf16, #tpu.memory_space<vmem>>, vector<256x128xbf16>
    %cst_14 = arith.constant dense<0.000000e+00> : vector<32x128xf32>
    %19 = tpu.matmul %17, %18, %cst_14 {dimension_numbers = #tpu.dot_dimension_numbers<[1], [0], [0], [1], [0, 0, 1, 1], [], []>} : vector<32x256xbf16>, vector<256x128xbf16>, vector<32x128xf32> -> vector<32x128xf32>
    %c0_15 = arith.constant 0 : index
    %c0_16 = arith.constant 0 : index
    %20 = vector.load %arg7[%c0_15, %c0_16] : memref<1x128xf32, #tpu.memory_space<vmem>>, vector<1x128xf32>
    %21 = vector.broadcast %20 : vector<1x128xf32> to vector<32x128xf32>
    %22 = arith.addf %19, %21 : vector<32x128xf32>
    %23 = arith.truncf %22 : vector<32x128xf32> to vector<32x128xbf16>
    %c0_17 = arith.constant 0 : index
    %c0_18 = arith.constant 0 : index
    %24 = vector.load %arg8[%c0_17, %c0_18] : memref<32x128xbf16, #tpu.memory_space<vmem>>, vector<32x128xbf16>
    tpu.vector_store %arg8[%c0_17, %c0_18], %23 {strides = array<i32>} : memref<32x128xbf16, #tpu.memory_space<vmem>>, vector<32x128xbf16>,
    return
  }
  func.func @transform_0(%arg0: i32) -> (i32, i32) {
    %c0_i32 = arith.constant 0 : i32
    %c0_i32_0 = arith.constant 0 : i32
    return %arg0, %c0_i32 : i32, i32
  }
  func.func @transform_1(%arg0: i32) -> (i32, i32) {
    %c0_i32 = arith.constant 0 : i32
    %c0_i32_0 = arith.constant 0 : i32
    %c0_i32_1 = arith.constant 0 : i32
    return %c0_i32, %c0_i32_0 : i32, i32
  }
  func.func @transform_2(%arg0: i32) -> (i32, i32) {
    %c0_i32 = arith.constant 0 : i32
    %c0_i32_0 = arith.constant 0 : i32
    %c0_i32_1 = arith.constant 0 : i32
    return %c0_i32, %c0_i32_0 : i32, i32
  }
  func.func @transform_3(%arg0: i32) -> (i32, i32) {
    %c0_i32 = arith.constant 0 : i32
    %c0_i32_0 = arith.constant 0 : i32
    %c0_i32_1 = arith.constant 0 : i32
    return %c0_i32, %c0_i32_0 : i32, i32
  }
  func.func @transform_4(%arg0: i32) -> (i32, i32) {
    %c0_i32 = arith.constant 0 : i32
    %c0_i32_0 = arith.constant 0 : i32
    %c0_i32_1 = arith.constant 0 : i32
    return %c0_i32, %c0_i32_0 : i32, i32
  }
  func.func @transform_5(%arg0: i32) -> (i32, i32) {
    %c0_i32 = arith.constant 0 : i32
    %c0_i32_0 = arith.constant 0 : i32
    %c0_i32_1 = arith.constant 0 : i32
    return %c0_i32, %c0_i32_0 : i32, i32
  }
  func.func @transform_6(%arg0: i32) -> (i32, i32) {
    %c0_i32 = arith.constant 0 : i32
    %c0_i32_0 = arith.constant 0 : i32
    %c0_i32_1 = arith.constant 0 : i32
    return %c0_i32, %c0_i32_0 : i32, i32
  }
  func.func @transform_7(%arg0: i32) -> (i32, i32) {
    %c0_i32 = arith.constant 0 : i32
    %c0_i32_0 = arith.constant 0 : i32
    return %arg0, %c0_i32 : i32, i32
  }
}

</mosaic_0001>

<bundles_post_ra>
// kernel: mlp_forward.1
= control target key start
LH: loop header
LB: loop body
LE: loop exit
PB: predicated region body
PF: predicated region fallthrough
CT: control target
= control target key end

     0   :  { %12 = vsyncpa [#allocation3], 0  ;;  %s2150_s0 = inlined_call_operand.hbm [shape: f32[8,784], index: 0, kind: input, shape index: {}]   ;;  %s2151_s1 = inlined_call_operand.hbm [shape: bf16[784,256], index: 1, kind: input, shape index: {}]   ;;  %s2152_s2 = inlined_call_operand.vmem [shape: f32[1,256], index: 2, kind: input, shape index: {}]   ;;  %s2153_s3 = inlined_call_operand.hbm [shape: bf16[256,256], index: 3, kind: input, shape index: {}]   ;;  %s2154_s4 = inlined_call_operand.vmem [shape: f32[1,256], index: 4, kind: input, shape index: {}]   ;;  %s2155_s5 = inlined_call_operand.hbm [shape: bf16[256,128], index: 5, kind: input, shape index: {}]   ;;  %s2156_s6 = inlined_call_operand.vmem [shape: f32[1,128], index: 6, kind: input, shape index: {}]   ;;  %s2157_s7 = inlined_call_operand.vmem [shape: bf16[8,128], index: 7, kind: output, shape index: {}]  }
   0x1   :  { %13 = vsyncpa [#allocation5], 0 }
   0x2   :  { %14 = vsyncpa [#allocation8], 0 }
   0x3   :  { %19 = vsyncadd [#allocation3], 2688  ;;  %s2014_s24 = smov [#allocation4]   ;;  %s1920_s28 = scalar_lea.hbm %s2151_s1, 12544 }
   0x4   :  { %s32_s25 = sshll.u32 %s2014_s24, 4  ;;  %p1921_p0 = scmp.ne.s32.totalorder %s2151_s1, %s1920_s28  ;;  %s33_s25 = int_to_ptr.vmem [resolvable:$true] %s32_s25 }
   0x5   :  { %p1924_p1 = scmp.lt.u32.totalorder %s1920_s28, %s2151_s1 }
   0x7   :  { %p1926_p2 = pnand %p1924_p1, %p1921_p0 }
   0x9   :  { %1929 = shalt.err (!%p1926_p2)
}
   0xa   :  { %s1930_s10 = scalar_lea.vmem %s33_s25, 12544  ;;  %p1935_p4 = scmp.lt.s32.totalorder %s33_s25, %s33_s25 }
   0xb   :  { %p1931_p3 = scmp.ne.s32.totalorder %s33_s25, %s1930_s10  ;;  %p1936_p5 = scmp.lt.s32.totalorder %s1930_s10, %s1930_s10 }
   0xd   :  { %p1937_p6 = por %p1936_p5, %p1935_p4 }
   0xf   :  { %p1938_p7 = pnand %p1937_p6, %p1931_p3 }
  0x11   :  { %1941 = shalt.err (!%p1938_p7)
}
  0x12   :  { %s2015_s11 = smov 128   ;;  %s2016_s12 = smov 8  }
  0x13   :  { %38 = dma.hbm_to_vmem [thread:$0]  %s2151_s1, 12544, %s33_s25, [#allocation5], %s2015_s11, %s2015_s11, %s2016_s12  }
  0x14   :  { %s2017_s15 = smov [#allocation2]   ;;  %s1942_s19 = scalar_lea.hbm %s2150_s0, 896 }
  0x15   :  { %s20_s16 = sshll.u32 %s2017_s15, 4  ;;  %p1943_p8 = scmp.ne.s32.totalorder %s2150_s0, %s1942_s19  ;;  %s21_s16 = int_to_ptr.vmem [resolvable:$true] %s20_s16 }
  0x16   :  { %p1946_p9 = scmp.lt.u32.totalorder %s1942_s19, %s2150_s0 }
  0x18   :  { %p1948_p10 = pnand %p1946_p9, %p1943_p8 }
  0x1a   :  { %1951 = shalt.err (!%p1948_p10)
}
  0x1b   :  { %s1952_s24 = scalar_lea.vmem %s21_s16, 896  ;;  %s1956_s1 = scalar_lea.vmem %s21_s16, 3584 }
  0x1c   :  { %p1953_p11 = scmp.ne.s32.totalorder %s21_s16, %s1952_s24  ;;  %p1957_p12 = scmp.lt.s32.totalorder %s21_s16, %s21_s16 }
  0x1d   :  { %p1958_p13 = scmp.lt.s32.totalorder %s1956_s1, %s1952_s24 }
  0x1f   :  { %p1959_p0 = por %p1958_p13, %p1957_p12 }
  0x21   :  { %p1960_p1 = pnand %p1959_p0, %p1953_p11 }
  0x23   :  { %1963 = shalt.err (!%p1960_p1)
}
  0x24   :  { %s2018_s25 = smov 896   ;;  %s2019_s26 = smov 56  }
  0x25   :  { %26 = dma.hbm_to_vmem [thread:$0]  %s2150_s0, 896, %s21_s16, [#allocation3], %s2018_s25, %s2018_s25, %s2019_s26  }
  0x26   :  { %s2020_s29 = smov [#allocation6]   ;;  %s2021_s8 = smov [#allocation7]  }
  0x27   :  { %s46_s30 = sshll.u32 %s2020_s29, 4  ;;  %s60_s9 = sshll.u32 %s2021_s8, 4  ;;  %s47_s30 = int_to_ptr.vmem [resolvable:$true] %s46_s30  ;;  %s2092_s9 = int_to_ptr.vmem [resolvable:$true] %s60_s9 }
  0x28   :  { %s1964_s14 = scalar_lea.hbm %s2153_s3, 4096 }
  0x29   :  { %p1965_p2 = scmp.ne.s32.totalorder %s2153_s3, %s1964_s14  ;;  %p1968_p3 = scmp.lt.u32.totalorder %s1964_s14, %s2153_s3 }
  0x2b   :  { %p1970_p4 = pnand %p1968_p3, %p1965_p2 }
  0x2d   :  { %1973 = shalt.err (!%p1970_p4)
}
  0x2e   :  { %s1974_s0 = scalar_lea.vmem %s47_s30, 4096  ;;  %p1979_p6 = scmp.lt.s32.totalorder %s47_s30, %s47_s30 }
  0x2f   :  { %p1975_p5 = scmp.ne.s32.totalorder %s47_s30, %s1974_s0  ;;  %p1980_p7 = scmp.lt.s32.totalorder %s1974_s0, %s1974_s0 }
  0x31   :  { %p1981_p8 = por %p1980_p7, %p1979_p6 }
  0x33   :  { %p1982_p9 = pnand %p1981_p8, %p1975_p5 }
  0x35   :  { %1985 = shalt.err (!%p1982_p9)
}
  0x36   :  { %52 = dma.hbm_to_vmem [thread:$0]  %s2153_s3, 4096, %s47_s30, [#allocation5], %s2015_s11, %s2015_s11, %s2016_s12  }
  0x37   :  { %s1986_s23 = scalar_lea.hbm %s2155_s5, 2048 }
  0x38   :  { %p1987_p10 = scmp.ne.s32.totalorder %s2155_s5, %s1986_s23  ;;  %p1990_p11 = scmp.lt.u32.totalorder %s1986_s23, %s2155_s5 }
  0x3a   :  { %p1992_p12 = pnand %p1990_p11, %p1987_p10 }
  0x3c   :  { %1995 = shalt.err (!%p1992_p12)
}
  0x3d   :  { %s1996_s27 = scalar_lea.vmem %s2092_s9, 2048  ;;  %p2001_p0 = scmp.lt.s32.totalorder %s2092_s9, %s2092_s9 }
  0x3e   :  { %p1997_p13 = scmp.ne.s32.totalorder %s2092_s9, %s1996_s27  ;;  %p2002_p1 = scmp.lt.s32.totalorder %s1996_s27, %s1996_s27 }
  0x40   :  { %p2003_p2 = por %p2002_p1, %p2001_p0 }
  0x42   :  { %p2004_p3 = pnand %p2003_p2, %p1997_p13 }
  0x44   :  { %2007 = shalt.err (!%p2004_p3)
}
  0x45   :  { %s2022_s3 = smov 64   ;;  %s2023_s11 = smov 4  }
  0x46   :  { %66 = dma.hbm_to_vmem [thread:$0]  %s2155_s5, 2048, %s2092_s9, [#allocation8], %s2022_s3, %s2022_s3, %s2023_s11  }
  0x47   :  { %2008 = dma.done.wait [#allocation3], 3584  }
  0x48   :  { %2009 = vsyncadd [#allocation3], 4294963712 }
  0x49   :  { %2010 = dma.done.wait [#allocation5], 16640  }
  0x4a   :  { %2011 = vsyncadd [#allocation5], 4294950656 }
  0x4b   :  { %2012 = dma.done.wait [#allocation8], 2048  }
  0x4c   :  { %2013 = vsyncadd [#allocation8], 4294965248  ;;  %v1709_v0 = vld [vmem:[#allocation4 + $0x104] ss:$8 sps:$4 sm:$0xff]   ;;  %v1711_v1 = vld [vmem:[#allocation4 + $0x100] ss:$8 sps:$4 sm:$0xff]  }
  0x4d   :  { %784 = vmatprep.subr.bf16.mxu0 %v1709_v0  ;;  %v1712_v2 = vld [vmem:[#allocation4 + $0x114] ss:$8 sps:$4 sm:$0xff]   ;;  %v1714_v3 = vld [vmem:[#allocation4 + $0x110] ss:$8 sps:$4 sm:$0xff]   ;;  %v1715_v4 = vld [vmem:[#allocation4 + $0x124] ss:$8 sps:$4 sm:$0xff]  }
  0x4e   :  { %785 = vmatpush1.bf16.msra.mxu0 %v1711_v1  ;;  %v1717_v5 = vld [vmem:[#allocation4 + $0x120] ss:$8 sps:$4 sm:$0xff]   ;;  %v1718_v6 = vld [vmem:[#allocation4 + $0x134] ss:$8 sps:$4 sm:$0xff]   ;;  %v1720_v7 = vld [vmem:[#allocation4 + $0x130] ss:$8 sps:$4 sm:$0xff]  }
  0x4f   :  { %786 = vmatprep.subr.bf16.mxu0 %v1712_v2  ;;  %v1721_v8 = vld [vmem:[#allocation4 + $0x144] ss:$8 sps:$4 sm:$0xff]   ;;  %v1723_v9 = vld [vmem:[#allocation4 + $0x140] ss:$8 sps:$4 sm:$0xff]   ;;  %v1724_v10 = vld [vmem:[#allocation4 + $0x154] ss:$8 sps:$4 sm:$0xff]  }
  0x50   :  { %v1726_v11 = vld [vmem:[#allocation4 + $0x150] ss:$8 sps:$4 sm:$0xff]   ;;  %v1727_v12 = vld [vmem:[#allocation4 + $0x164] ss:$8 sps:$4 sm:$0xff]   ;;  %v1729_v16 = vld [vmem:[#allocation4 + $0x160] ss:$8 sps:$4 sm:$0xff]  }
  0x51   :  { %v85_v13 = vld [vmem:[#allocation2 + $0x18] sm:$0xff]  ;;  %v92_v14 = vld [vmem:[#allocation2 + $0x50] sm:$0xff]  ;;  %v1766_v19 = vld [vmem:[#allocation4 + $0x4] ss:$8 sps:$4 sm:$0xff]   ;;  %vm724_vm0 = vcmask 130048  }
  0x52   :  { %787 = vmatpush1.bf16.msra.mxu0 %v1714_v3  ;;  %v113_v15 = vpack.c.bf16 %v92_v14, %v85_v13  ;;  %v1730_v17 = vld [vmem:[#allocation4 + $0x174] ss:$8 sps:$4 sm:$0xff]   ;;  %v1732_v18 = vld [vmem:[#allocation4 + $0x170] ss:$8 sps:$4 sm:$0xff]   ;;  %v1733_v20 = vld [vmem:[#allocation4 + $0x184] ss:$8 sps:$4 sm:$0xff]   ;;  %731 = vmatprep.subr.bf16.mxu1 %v1766_v19 }
  0x53   :  { %788 = vmatprep.subr.bf16.mxu0 %v1715_v4  ;;  %v1771_v21 = vld [vmem:[#allocation4] ss:$8 sps:$4 sm:$0xff]   ;;  %v1772_v22 = vld [vmem:[#allocation4 + $0x14] ss:$8 sps:$4 sm:$0xff]   ;;  %v1777_v25 = vld [vmem:[#allocation4 + $0x10] ss:$8 sps:$4 sm:$0xff]  }
  0x54   :  { %816 = vmatprep.mubr.bf16.mxu0 %v113_v15  ;;  %v1735_v23 = vld [vmem:[#allocation4 + $0x180] ss:$8 sps:$4 sm:$0xff]   ;;  %v1736_v24 = vld [vmem:[#allocation4 + $0x194] ss:$8 sps:$4 sm:$0xff]   ;;  %732 = vmatpush1.bf16.msra.mxu1 %v1771_v21  ;;  %v1778_v26 = vld [vmem:[#allocation4 + $0x24] ss:$8 sps:$4 sm:$0xff]  }
  0x55   :  { %733 = vmatprep.subr.bf16.mxu1 %v1772_v22  ;;  %v1738_v27 = vld [vmem:[#allocation4 + $0x190] ss:$8 sps:$4 sm:$0xff]   ;;  %v1783_v28 = vld [vmem:[#allocation4 + $0x20] ss:$8 sps:$4 sm:$0xff]   ;;  %v1739_v29 = vld [vmem:[#allocation4 + $0x1a4] ss:$8 sps:$4 sm:$0xff]  }
  0x56   :  { %789 = vmatpush1.bf16.msra.mxu0 %v1717_v5  ;;  %v1784_v30 = vld [vmem:[#allocation4 + $0x34] ss:$8 sps:$4 sm:$0xff]   ;;  %v1741_v31 = vld [vmem:[#allocation4 + $0x1a0] ss:$8 sps:$4 sm:$0xff]   ;;  %v1789_v33 = vld [vmem:[#allocation4 + $0x30] ss:$8 sps:$4 sm:$0xff]  }
  0x57   :  { %790 = vmatprep.subr.bf16.mxu0 %v1718_v6  ;;  %v1742_v32 = vld [vmem:[#allocation4 + $0x1b4] ss:$8 sps:$4 sm:$0xff]   ;;  %v1790_v34 = vld [vmem:[#allocation4 + $0x44] ss:$8 sps:$4 sm:$0xff]   ;;  %v1744_v35 = vld [vmem:[#allocation4 + $0x1b0] ss:$8 sps:$4 sm:$0xff]  }
  0x58   :  { %734 = vmatpush1.bf16.msra.mxu1 %v1777_v25  ;;  %v1795_v36 = vld [vmem:[#allocation4 + $0x40] ss:$8 sps:$4 sm:$0xff]   ;;  %v1745_v37 = vld [vmem:[#allocation4 + $0x1c4] ss:$8 sps:$4 sm:$0xff]   ;;  %v1796_v38 = vld [vmem:[#allocation4 + $0x54] ss:$8 sps:$4 sm:$0xff]  }
  0x59   :  { %735 = vmatprep.subr.bf16.mxu1 %v1778_v26  ;;  %v1747_v39 = vld [vmem:[#allocation4 + $0x1c0] ss:$8 sps:$4 sm:$0xff]   ;;  %v1748_v40 = vld [vmem:[#allocation4 + $0x1d4] ss:$8 sps:$4 sm:$0xff]   ;;  %v1801_v41 = vld [vmem:[#allocation4 + $0x50] ss:$8 sps:$4 sm:$0xff]  }
  0x5a   :  { %791 = vmatpush1.bf16.msra.mxu0 %v1720_v7  ;;  %v1802_v42 = vld [vmem:[#allocation4 + $0x64] ss:$8 sps:$4 sm:$0xff]   ;;  %v1750_v43 = vld [vmem:[#allocation4 + $0x1d0] ss:$8 sps:$4 sm:$0xff]   ;;  %v1807_v44 = vld [vmem:[#allocation4 + $0x60] ss:$8 sps:$4 sm:$0xff]  }
  0x5b   :  { %792 = vmatprep.subr.bf16.mxu0 %v1721_v8  ;;  %v1751_v45 = vld [vmem:[#allocation4 + $0x1e4] ss:$8 sps:$4 sm:$0xff]   ;;  %v1808_v46 = vld [vmem:[#allocation4 + $0x74] ss:$8 sps:$4 sm:$0xff]   ;;  %v1753_v47 = vld [vmem:[#allocation4 + $0x1e0] ss:$8 sps:$4 sm:$0xff]  }
  0x5c   :  { %736 = vmatpush1.bf16.msra.mxu1 %v1783_v28  ;;  %v1813_v48 = vld [vmem:[#allocation4 + $0x70] ss:$8 sps:$4 sm:$0xff]   ;;  %v1754_v49 = vld [vmem:[#allocation4 + $0x1f4] ss:$8 sps:$4 sm:$0xff]   ;;  %v1814_v50 = vld [vmem:[#allocation4 + $0x84] ss:$8 sps:$4 sm:$0xff]  }
  0x5d   :  { %737 = vmatprep.subr.bf16.mxu1 %v1784_v30  ;;  %v1756_v51 = vld [vmem:[#allocation4 + $0x1f0] ss:$8 sps:$4 sm:$0xff]   ;;  %v1759_v52 = vld [vmem:[#allocation4 + $0x204] ss:$8 sps:$4 sm:$0xff]   ;;  %v1819_v55 = vld [vmem:[#allocation4 + $0x80] ss:$8 sps:$4 sm:$0xff]  }
  0x5e   :  { %793 = vmatpush1.bf16.msra.mxu0 %v1723_v9  ;;  %v84_v53 = vld [vmem:[#allocation2 + $0x10] sm:$0xff]  ;;  %v91_v54 = vld [vmem:[#allocation2 + $0x48] sm:$0xff]  ;;  %v106_v60 = vld [vmem:[#allocation2 + $0xc0] sm:$0xff] }
  0x5f   :  { %794 = vmatprep.subr.bf16.mxu0 %v1724_v10  ;;  %v1820_v56 = vld [vmem:[#allocation4 + $0x94] ss:$8 sps:$4 sm:$0xff]   ;;  %v1757_v57 = vld [vmem:[#allocation4 + $0x200] ss:$8 sps:$4 sm:$0xff]   ;;  %v112_v58 = vpack.c.bf16 %v91_v54, %v84_v53  ;;  %v1825_v61 = vld [vmem:[#allocation4 + $0x90] ss:$8 sps:$4 sm:$0xff]  }
  0x60   :  { %738 = vmatpush1.bf16.msra.mxu1 %v1789_v33  ;;  %v99_v59 = vld [vmem:[#allocation2 + $0x88] sm:$0xff]  ;;  %v1762_v62 = vld [vmem:[#allocation4 + $0x214] ss:$8 sps:$4 sm:$0xff]   ;;  %v1760_v1 = vld [vmem:[#allocation4 + $0x210] ss:$8 sps:$4 sm:$0xff]  }
  0x61   :  { %739 = vmatprep.subr.bf16.mxu1 %v1790_v34  ;;  %v1826_v63 = vld [vmem:[#allocation4 + $0xa4] ss:$8 sps:$4 sm:$0xff]   ;;  %v120_v0 = vpack.c.bf16 %v106_v60, %v99_v59  ;;  %v1831_v2 = vld [vmem:[#allocation4 + $0xa0] ss:$8 sps:$4 sm:$0xff]   ;;  %v105_v4 = vld [vmem:[#allocation2 + $0xb8] sm:$0xff] }
  0x62   :  { %795 = vmatpush1.bf16.msra.mxu0 %v1726_v11  ;;  %v98_v3 = vld [vmem:[#allocation2 + $0x80] sm:$0xff]  ;;  %v1832_v6 = vld [vmem:[#allocation4 + $0xb4] ss:$8 sps:$4 sm:$0xff]   ;;  %v87_v8 = vld [vmem:[#allocation2 + $0x28] sm:$0xff] }
  0x63   :  { %796 = vmatprep.subr.bf16.mxu0 %v1727_v12  ;;  %v1765_v5 = vld [vmem:[#allocation4 + $0x224] ss:$8 sps:$4 sm:$0xff]   ;;  %v119_v7 = vpack.c.bf16 %v105_v4, %v98_v3  ;;  %v1763_v11 = vld [vmem:[#allocation4 + $0x220] ss:$8 sps:$4 sm:$0xff]   ;;  %v1837_v12 = vld [vmem:[#allocation4 + $0xb0] ss:$8 sps:$4 sm:$0xff]  }
  0x64   :  { %740 = vmatpush1.bf16.msra.mxu1 %v1795_v36  ;;  %v94_v9 = vld [vmem:[#allocation2 + $0x60] sm:$0xff]  ;;  %v83_v10 = vld [vmem:[#allocation2 + $0x8] sm:$0xff]  ;;  %v1770_v14 = vld [vmem:[#allocation4 + $0x234] ss:$8 sps:$4 sm:$0xff]  }
  0x65   :  { %741 = vmatprep.subr.bf16.mxu1 %v1796_v38  ;;  %v90_v13 = vld [vmem:[#allocation2 + $0x40] sm:$0xff]  ;;  %v1844_v21 = vld [vmem:[#allocation4 + $0xd4] ss:$8 sps:$4 sm:$0xff]   ;;  %v1780_v26 = vld [vmem:[#allocation4 + $0x250] ss:$8 sps:$4 sm:$0xff]  }
  0x66   :  { %797 = vmatpush1.bf16.msra.mxu0 %v1729_v16  ;;  %v1838_v15 = vld [vmem:[#allocation4 + $0xc4] ss:$8 sps:$4 sm:$0xff]   ;;  %v111_v16 = vpack.c.bf16 %v90_v13, %v83_v10  ;;  %v1774_v22 = vld [vmem:[#allocation4 + $0x240] ss:$8 sps:$4 sm:$0xff]   ;;  %v89_v34 = vld [vmem:[#allocation2 + $0x38] sm:$0xff] }
  0x67   :  { %798 = vmatprep.subr.bf16.mxu0 %v1730_v17  ;;  %v115_v17 = vpack.c.bf16 %v94_v9, %v87_v8  ;;  %v1776_v19 = vld [vmem:[#allocation4 + $0x244] ss:$8 sps:$4 sm:$0xff]   ;;  %v1852_v28 = vld [vmem:[#allocation4 + $0xe0] ss:$8 sps:$4 sm:$0xff]   ;;  %v104_v36 = vld [vmem:[#allocation2 + $0xb0] sm:$0xff] }
  0x68   :  { %742 = vmatpush1.bf16.msra.mxu1 %v1801_v41  ;;  %763 = vmatprep.mubr.bf16.mxu1 %v111_v16  ;;  %v1850_v25 = vld [vmem:[#allocation4 + $0xe4] ss:$8 sps:$4 sm:$0xff]   ;;  %v1786_v30 = vld [vmem:[#allocation4 + $0x260] ss:$8 sps:$4 sm:$0xff]   ;;  %v1792_v38 = vld [vmem:[#allocation4 + $0x270] ss:$8 sps:$4 sm:$0xff]  }
  0x69   :  { %743 = vmatprep.subr.bf16.mxu1 %v1802_v42  ;;  %v82_v33 = vld [vmem:[#allocation2] sm:$0xff]  ;;  %v1856_v42 = vld [vmem:[#allocation6] ss:$8 sps:$4 sm:$0xff]   ;;  %v1842_v8 = vld [vmem:[#allocation4 + $0x2f4] ss:$8 sps:$4 sm:$0xff]  }
  0x6a   :  { %799 = vmatpush1.bf16.msra.mxu0 %v1732_v18  ;;  %v1768_v18 = vld [vmem:[#allocation4 + $0x230] ss:$8 sps:$4 sm:$0xff]   ;;  %v1867_v54 = vld [vmem:[#allocation6 + $0x34] ss:$8 sps:$4 sm:$0xff]   ;;  %v1877_v9 = vld [vmem:[#allocation6 + $0x70] ss:$8 sps:$4 sm:$0xff]  }
  0x6b   :  { %800 = vmatprep.subr.bf16.mxu0 %v1733_v20  ;;  %v1843_v20 = vld [vmem:[#allocation4 + $0xc0] ss:$8 sps:$4 sm:$0xff]   ;;  %v1862_v53 = vld [vmem:[#allocation6 + $0x20] ss:$8 sps:$4 sm:$0xff]   ;;  %v1824_v60 = vld [vmem:[#allocation4 + $0x2c4] ss:$8 sps:$4 sm:$0xff]  }
  0x6c   :  { %744 = vmatpush1.bf16.msra.mxu1 %v1807_v44  ;;  %v1798_v44 = vld [vmem:[#allocation4 + $0x280] ss:$8 sps:$4 sm:$0xff]   ;;  %v1816_v59 = vld [vmem:[#allocation4 + $0x2b0] ss:$8 sps:$4 sm:$0xff]   ;;  %v1836_v4 = vld [vmem:[#allocation4 + $0x2e4] ss:$8 sps:$4 sm:$0xff]  }
  0x6d   :  { %745 = vmatprep.subr.bf16.mxu1 %v1808_v46  ;;  %v103_v46 = vld [vmem:[#allocation2 + $0xa8] sm:$0xff]  ;;  %v1828_v3 = vld [vmem:[#allocation4 + $0x2d0] ss:$8 sps:$4 sm:$0xff]   ;;  %v1882_v10 = vld [vmem:[#allocation6 + $0x84] ss:$8 sps:$4 sm:$0xff]  }
  0x6e   :  { %801 = vmatpush1.bf16.msra.mxu0 %v1735_v23  ;;  %v1782_v23 = vld [vmem:[#allocation4 + $0x254] ss:$8 sps:$4 sm:$0xff]  }
  0x6f   :  { %802 = vmatprep.subr.bf16.mxu0 %v1736_v24  ;;  %v1849_v24 = vld [vmem:[#allocation4 + $0xd0] ss:$8 sps:$4 sm:$0xff]  }
  0x70   :  { %746 = vmatpush1.bf16.msra.mxu1 %v1813_v48  ;;  %v1859_v48 = vld [vmem:[#allocation6 + $0x10] ss:$8 sps:$4 sm:$0xff]   ;;  %v93_v13 = vld [vmem:[#allocation2 + $0x58] sm:$0xff]  ;;  %v108_v16 = vld [vmem:[#allocation2 + $0xd0] sm:$0xff] }
  0x71   :  { %747 = vmatprep.subr.bf16.mxu1 %v1814_v50  ;;  %v1804_v50 = vld [vmem:[#allocation4 + $0x290] ss:$8 sps:$4 sm:$0xff]  }
  0x72   :  { %803 = vmatpush1.bf16.msra.mxu0 %v1738_v27  ;;  %v1788_v27 = vld [vmem:[#allocation4 + $0x264] ss:$8 sps:$4 sm:$0xff]  }
  0x73   :  { %804 = vmatprep.subr.bf16.mxu0 %v1739_v29  ;;  %v1853_v29 = vld [vmem:[#allocation4 + $0xf4] ss:$8 sps:$4 sm:$0xff]  }
  0x74   :  { %748 = vmatpush1.bf16.msra.mxu1 %v1819_v55  ;;  %v1810_v55 = vld [vmem:[#allocation4 + $0x2a0] ss:$8 sps:$4 sm:$0xff]  }
  0x75   :  { %749 = vmatprep.subr.bf16.mxu1 %v1820_v56  ;;  %v1818_v56 = vld [vmem:[#allocation4 + $0x2b4] ss:$8 sps:$4 sm:$0xff]  }
  0x76   :  { %805 = vmatpush1.bf16.msra.mxu0 %v1741_v31  ;;  %v1855_v31 = vld [vmem:[#allocation4 + $0xf0] ss:$8 sps:$4 sm:$0xff]  }
  0x77   :  { %806 = vmatprep.subr.bf16.mxu0 %v1742_v32  ;;  %v1794_v32 = vld [vmem:[#allocation4 + $0x274] ss:$8 sps:$4 sm:$0xff]  }
  0x78   :  { %750 = vmatpush1.bf16.msra.mxu1 %v1825_v61  ;;  %v1868_v61 = vld [vmem:[#allocation6 + $0x40] ss:$8 sps:$4 sm:$0xff]  }
  0x79   :  { %751 = vmatprep.subr.bf16.mxu1 %v1826_v63  ;;  %v1822_v63 = vld [vmem:[#allocation4 + $0x2c0] ss:$8 sps:$4 sm:$0xff]  }
  0x7a   :  { %807 = vmatpush1.bf16.msra.mxu0 %v1744_v35  ;;  %v97_v35 = vld [vmem:[#allocation2 + $0x78] sm:$0xff] }
  0x7b   :  { %808 = vmatprep.subr.bf16.mxu0 %v1745_v37  ;;  %v1858_v37 = vld [vmem:[#allocation6 + $0x4] ss:$8 sps:$4 sm:$0xff]   ;;  %v118_v41 = vpack.c.bf16 %v104_v36, %v97_v35  ;;  %v102_v36 = vld [vmem:[#allocation2 + $0xa0] sm:$0xff] }
  0x7c   :  { %752 = vmatpush1.bf16.msra.mxu1 %v1831_v2  ;;  %v1876_v2 = vld [vmem:[#allocation6 + $0x64] ss:$8 sps:$4 sm:$0xff]  }
  0x7d   :  { %753 = vmatprep.subr.bf16.mxu1 %v1832_v6  ;;  %v1879_v6 = vld [vmem:[#allocation6 + $0x74] ss:$8 sps:$4 sm:$0xff]  }
  0x7e   :  { %809 = vmatpush1.bf16.msra.mxu0 %v1747_v39  ;;  %v110_v39 = vpack.c.bf16 %v89_v34, %v82_v33  ;;  %v95_v33 = vld [vmem:[#allocation2 + $0x68] sm:$0xff]  ;;  %v1892_v34 = vld [vmem:[#allocation6 + $0xc0] ss:$8 sps:$4 sm:$0xff]  }
  0x7f   :  { %810 = vmatprep.subr.bf16.mxu0 %v1748_v40  ;;  %v1800_v40 = vld [vmem:[#allocation4 + $0x284] ss:$8 sps:$4 sm:$0xff]  }
  0x80   :  { %754 = vmatpush1.bf16.msra.mxu1 %v1837_v12  ;;  %v86_v12 = vld [vmem:[#allocation2 + $0x20] sm:$0xff] }
  0x81   :  { %755 = vmatprep.subr.bf16.mxu1 %v1838_v15  ;;  %v101_v15 = vld [vmem:[#allocation2 + $0x98] sm:$0xff] }
  0x82   :  { %811 = vmatpush1.bf16.msra.mxu0 %v1750_v43  ;;  %v1861_v43 = vld [vmem:[#allocation6 + $0x14] ss:$8 sps:$4 sm:$0xff]  }
  0x83   :  { %812 = vmatprep.subr.bf16.mxu0 %v1751_v45  ;;  %v96_v45 = vld [vmem:[#allocation2 + $0x70] sm:$0xff] }
  0x84   :  { %756 = vmatpush1.bf16.msra.mxu1 %v1843_v20  ;;  %v1846_v20 = vld [vmem:[#allocation4 + $0x300] ss:$8 sps:$4 sm:$0xff]  }
  0x85   :  { %757 = vmatprep.subr.bf16.mxu1 %v1844_v21  ;;  %v122_v21 = vpack.c.bf16 %v108_v16, %v101_v15 }
  0x86   :  { %813 = vmatpush1.bf16.msra.mxu0 %v1753_v47  ;;  %v1806_v47 = vld [vmem:[#allocation4 + $0x294] ss:$8 sps:$4 sm:$0xff]  }
  0x87   :  { %814 = vmatprep.subr.bf16.mxu0 %v1754_v49  ;;  %v1864_v49 = vld [vmem:[#allocation6 + $0x24] ss:$8 sps:$4 sm:$0xff]  }
  0x88   :  { %758 = vmatpush1.bf16.msra.mxu1 %v1849_v24  ;;  %v100_v24 = vld [vmem:[#allocation2 + $0x90] sm:$0xff] }
  0x89   :  { %759 = vmatprep.subr.bf16.mxu1 %v1850_v25  ;;  %v107_v25 = vld [vmem:[#allocation2 + $0xc8] sm:$0xff] }
  0x8a   :  { %815 = vmatpush1.bf16.msra.mxu0 %v1756_v51  ;;  %v1812_v51 = vld [vmem:[#allocation4 + $0x2a4] ss:$8 sps:$4 sm:$0xff]  }
  0x8b   :  { %837 = vmatprep.subr.bf16.mxu0 %v1759_v52  ;;  %v117_v52 = vpack.c.bf16 %v103_v46, %v96_v45  ;;  %v1904_v45 = vld [vmem:[#allocation7 + $0x40] sm:$0xff]  }
  0x8c   :  { %760 = vmatpush1.bf16.msra.mxu1 %v1852_v28  ;;  %v121_v28 = vpack.c.bf16 %v107_v25, %v100_v24 }
  0x8d   :  { %817 = vmatmul.mubr.bf16.vlgmr.msra.gmra.mrb[0].mxu0 %v112_v58  ;;  %761 = vmatprep.subr.bf16.mxu1 %v1853_v29  ;;  %v1870_v58 = vld [vmem:[#allocation6 + $0x44] ss:$8 sps:$4 sm:$0xff]   ;;  %v1889_v29 = vld [vmem:[#allocation6 + $0xb0] ss:$8 sps:$4 sm:$0xff]  }
  0x8e   :  { %838 = vmatpush1.bf16.msra.mxu0 %v1757_v57  ;;  %826 = vmatprep.mubr.bf16.mxu0 %v120_v0  ;;  %v1865_v57 = vld [vmem:[#allocation6 + $0x30] ss:$8 sps:$4 sm:$0xff]   ;;  %v1830_v0 = vld [vmem:[#allocation4 + $0x2d4] ss:$8 sps:$4 sm:$0xff]  }
  0x8f   :  { %839 = vmatprep.subr.bf16.mxu0 %v1762_v62  ;;  %v1873_v62 = vld [vmem:[#allocation6 + $0x54] ss:$8 sps:$4 sm:$0xff]  }
  0x90   :  { %762 = vmatpush1.bf16.msra.mxu1 %v1855_v31  ;;  %v2024_v31 = vmov 0  }
  0x91   :  { %1159 = vmatprep.subr.bf16.mxu1 %v1858_v37  ;;  %v109_v37 = vld [vmem:[#allocation2 + $0xd8] sm:$0xff] }
  0x92   :  { %840 = vmatpush1.bf16.msra.mxu0 %v1760_v1  ;;  %v1871_v1 = vld [vmem:[#allocation6 + $0x50] ss:$8 sps:$4 sm:$0xff]  }
  0x93   :  { %841 = vmatprep.subr.bf16.mxu0 %v1765_v5  ;;  %764 = vmatmul.mubr.bf16.vlgmr.msra.gmra.mrb[0].mxu1 %v110_v39  ;;  %v1874_v5 = vld [vmem:[#allocation6 + $0x60] ss:$8 sps:$4 sm:$0xff]   ;;  %v1895_v39 = vld [vmem:[#allocation6 + $0xd0] ss:$8 sps:$4 sm:$0xff]  }
  0x94   :  { %773 = vmatprep.mubr.bf16.mxu1 %v118_v41  ;;  %1160 = vmatpush1.bf16.msra.mxu1 %v1856_v42  ;;  %v1900_v41 = vld [vmem:[#allocation6 + $0xe4] ss:$8 sps:$4 sm:$0xff]   ;;  %v1898_v42 = vld [vmem:[#allocation6 + $0xe0] ss:$8 sps:$4 sm:$0xff]  }
  0x95   :  { %827 = vmatmul.mubr.bf16.gmra.mrb[4].mxu0 %v119_v7  ;;  %1161 = vmatprep.subr.bf16.mxu1 %v1861_v43  ;;  %v1834_v7 = vld [vmem:[#allocation4 + $0x2e0] ss:$8 sps:$4 sm:$0xff]   ;;  %v1903_v43 = vld [vmem:[#allocation6 + $0xf4] ss:$8 sps:$4 sm:$0xff]  }
  0x96   :  { %842 = vmatpush1.bf16.msra.mxu0 %v1763_v11  ;;  %869 = vmatprep.mubr.bf16.mxu0 %v115_v17  ;;  %v1840_v11 = vld [vmem:[#allocation4 + $0x2f0] ss:$8 sps:$4 sm:$0xff]  }
  0x97   :  { %843 = vmatprep.subr.bf16.mxu0 %v1770_v14  ;;  %v1848_v14 = vld [vmem:[#allocation4 + $0x304] ss:$8 sps:$4 sm:$0xff]   ;;  %v1880_v17 = vld [vmem:[#allocation6 + $0x80] ss:$8 sps:$4 sm:$0xff]  }
  0x98   :  { %1162 = vmatpush1.bf16.msra.mxu1 %v1859_v48 }
  0x99   :  { %1163 = vmatprep.subr.bf16.mxu1 %v1864_v49 }
  0x9a   :  { %844 = vmatpush1.bf16.msra.mxu0 %v1768_v18  ;;  %v1885_v18 = vld [vmem:[#allocation6 + $0x94] ss:$8 sps:$4 sm:$0xff]  }
  0x9b   :  { %845 = vmatprep.subr.bf16.mxu0 %v1776_v19  ;;  %774 = vmatmul.mubr.bf16.gmra.mrb[4].mxu1 %v117_v52  ;;  %v114_v19 = vpack.c.bf16 %v93_v13, %v86_v12 }
  0x9c   :  { %1164 = vmatpush1.bf16.msra.mxu1 %v1862_v53 }
  0x9d   :  { %1165 = vmatprep.subr.bf16.mxu1 %v1867_v54  ;;  %v224_v54 = vlaneseq }
  0x9e   :  { %846 = vmatpush1.bf16.msra.mxu0 %v1774_v22  ;;  %v1883_v22 = vld [vmem:[#allocation6 + $0x90] ss:$8 sps:$4 sm:$0xff]  }
  0x9f   :  { %847 = vmatprep.subr.bf16.mxu0 %v1782_v23  ;;  %v1888_v23 = vld [vmem:[#allocation6 + $0xa4] ss:$8 sps:$4 sm:$0xff]  }
  0xa0   :  { %1166 = vmatpush1.bf16.msra.mxu1 %v1865_v57  ;;  %v222_v57 = vld [vmem:[%s2152_s2] sm:$0x3] }
  0xa1   :  { %1167 = vmatprep.subr.bf16.mxu1 %v1870_v58 }
  0xa2   :  { %848 = vmatpush1.bf16.msra.mxu0 %v1780_v26  ;;  %v1886_v26 = vld [vmem:[#allocation6 + $0xa0] ss:$8 sps:$4 sm:$0xff]  }
  0xa3   :  { %849 = vmatprep.subr.bf16.mxu0 %v1788_v27  ;;  %v1891_v27 = vld [vmem:[#allocation6 + $0xb4] ss:$8 sps:$4 sm:$0xff]  }
  0xa4   :  { %1168 = vmatpush1.bf16.msra.mxu1 %v1868_v61 }
  0xa5   :  { %1169 = vmatprep.subr.bf16.mxu1 %v1873_v62 }
  0xa6   :  { %850 = vmatpush1.bf16.msra.mxu0 %v1786_v30  ;;  %v1894_v30 = vld [vmem:[#allocation6 + $0xc4] ss:$8 sps:$4 sm:$0xff]  }
  0xa7   :  { %851 = vmatprep.subr.bf16.mxu0 %v1794_v32  ;;  %v88_v32 = vld [vmem:[#allocation2 + $0x30] sm:$0xff] }
  0xa8   :  { %1170 = vmatpush1.bf16.msra.mxu1 %v1871_v1  ;;  %v116_v35 = vpack.c.bf16 %v95_v33, %v88_v32  ;;  %v1908_v32 = vld [vmem:[#allocation7 + $0x50] sm:$0xff]  }
  0xa9   :  { %1171 = vmatprep.subr.bf16.mxu1 %v1876_v2 }
  0xaa   :  { %852 = vmatpush1.bf16.msra.mxu0 %v1792_v38  ;;  %v123_v38 = vpack.c.bf16 %v109_v37, %v102_v36  ;;  %v1909_v37 = vld [vmem:[#allocation7 + $0x10] sm:$0xff]  }
  0xab   :  { %853 = vmatprep.subr.bf16.mxu0 %v1800_v40  ;;  %v1897_v40 = vld [vmem:[#allocation6 + $0xd4] ss:$8 sps:$4 sm:$0xff]  }
  0xac   :  { %1172 = vmatpush1.bf16.msra.mxu1 %v1874_v5 }
  0xad   :  { %1173 = vmatprep.subr.bf16.mxu1 %v1879_v6 }
  0xae   :  { %854 = vmatpush1.bf16.msra.mxu0 %v1798_v44  ;;  %v1901_v44 = vld [vmem:[#allocation6 + $0xf0] ss:$8 sps:$4 sm:$0xff]  }
  0xaf   :  { %855 = vmatprep.subr.bf16.mxu0 %v1806_v47 }
  0xb0   :  { %1174 = vmatpush1.bf16.msra.mxu1 %v1877_v9 }
  0xb1   :  { %1175 = vmatprep.subr.bf16.mxu1 %v1882_v10 }
  0xb2   :  { %856 = vmatpush1.bf16.msra.mxu0 %v1804_v50 }
  0xb3   :  { %857 = vmatprep.subr.bf16.mxu0 %v1812_v51 }
  0xb4   :  { %1176 = vmatpush1.bf16.msra.mxu1 %v1880_v17 }
  0xb5   :  { %1177 = vmatprep.subr.bf16.mxu1 %v1885_v18  ;;  %v1905_v18 = vld [vmem:[#allocation7] sm:$0xff]  }
  0xb6   :  { %858 = vmatpush1.bf16.msra.mxu0 %v1810_v55  ;;  %v2126_v55 = vshrl.u32 %v224_v54, 7 }
  0xb7   :  { %859 = vmatprep.subr.bf16.mxu0 %v1818_v56 }
  0xb8   :  { %1178 = vmatpush1.bf16.msra.mxu1 %v1883_v22  ;;  %v226_v56 = vsub.s32 0, %v2126_v55  ;;  %v230_v58 = vsub.s32 1, %v2126_v55  ;;  %v1906_v22 = vld [vmem:[#allocation7 + $0x48] sm:$0xff]  }
  0xb9   :  { %1179 = vmatprep.subr.bf16.mxu1 %v1888_v23 }
  0xba   :  { %860 = vmatpush1.bf16.msra.mxu0 %v1816_v59  ;;  %v227_v59 = vrot.slane %v222_v57, %v226_v56 }
  0xbb   :  { %861 = vmatprep.subr.bf16.mxu0 %v1824_v60  ;;  %v231_v60 = vrot.slane %v222_v57, %v230_v58 }
  0xbc   :  { %1180 = vmatpush1.bf16.msra.mxu1 %v1886_v26 }
  0xbd   :  { %1181 = vmatprep.subr.bf16.mxu1 %v1891_v27 }
  0xbe   :  { %862 = vmatpush1.bf16.msra.mxu0 %v1822_v63 }
  0xbf   :  { %863 = vmatprep.subr.bf16.mxu0 %v1830_v0 }
  0xc0   :  { %1182 = vmatpush1.bf16.msra.mxu1 %v1889_v29  ;;  %v1907_v29 = vld [vmem:[#allocation7 + $0x8] sm:$0xff]  }
  0xc1   :  { %1183 = vmatprep.subr.bf16.mxu1 %v1894_v30 }
  0xc2   :  { %864 = vmatpush1.bf16.msra.mxu0 %v1828_v3 }
  0xc3   :  { %865 = vmatprep.subr.bf16.mxu0 %v1836_v4 }
  0xc4   :  { %1184 = vmatpush1.bf16.msra.mxu1 %v1892_v34 }
  0xc5   :  { %1185 = vmatprep.subr.bf16.mxu1 %v1897_v40  ;;  %v1912_v40 = vld [vmem:[#allocation7 + $0x60] sm:$0xff]  }
  0xc6   :  { %866 = vmatpush1.bf16.msra.mxu0 %v1834_v7 }
  0xc7   :  { %867 = vmatprep.subr.bf16.mxu0 %v1842_v8 }
  0xc8   :  { %1186 = vmatpush1.bf16.msra.mxu1 %v1895_v39  ;;  %v1911_v39 = vld [vmem:[#allocation7 + $0x18] sm:$0xff]  }
  0xc9   :  { %1187 = vmatprep.subr.bf16.mxu1 %v1900_v41  ;;  %v1913_v41 = vld [vmem:[#allocation7 + $0x20] sm:$0xff]  }
  0xca   :  { %868 = vmatpush1.bf16.msra.mxu0 %v1840_v11 }
  0xcb   :  { %890 = vmatprep.subr.bf16.mxu0 %v1848_v14 }
  0xcc   :  { %1188 = vmatpush1.bf16.msra.mxu1 %v1898_v42  ;;  %v1914_v42 = vld [vmem:[#allocation7 + $0x68] sm:$0xff]  }
  0xcd   :  { %870 = vmatmul.mubr.bf16.vlgmr.msra.gmra.mrb[0].mxu0 %v114_v19  ;;  %1189 = vmatprep.subr.bf16.mxu1 %v1903_v43  ;;  %v1915_v43 = vld [vmem:[#allocation7 + $0x28] sm:$0xff]  }
  0xce   :  { %891 = vmatpush1.bf16.msra.mxu0 %v1846_v20  ;;  %879 = vmatprep.mubr.bf16.mxu0 %v122_v21 }
  0xd0   :  { %1190 = vmatpush1.bf16.msra.mxu1 %v1901_v44  ;;  %v1916_v44 = vld [vmem:[#allocation7 + $0x70] sm:$0xff]  }
  0xd1   :  { %1638 = vmatprep.subr.bf16.mxu1 %v1904_v45  ;;  %v1917_v45 = vld [vmem:[#allocation7 + $0x30] sm:$0xff]  }
  0xd5   :  { %880 = vmatmul.mubr.bf16.gmra.mrb[4].mxu0 %v121_v28 }
  0xd6   :  { %922 = vmatprep.mubr.bf16.mxu0 %v2024_v31 }
  0xdd   :  { %1568 = vmatmul.mubr.msk.bf16.vlgmr.msra.gmra.mrb[0].mxu0 %vm724_vm0, %v116_v35 }
  0xde   :  { %932 = vmatprep.mubr.bf16.mxu0 %v2024_v31 }
  0xe5   :  { %1569 = vmatmul.mubr.msk.bf16.gmra.mrb[4].mxu0 %vm724_vm0, %v123_v38  ;;  %v1910_v38 = vld [vmem:[#allocation7 + $0x58] sm:$0xff]  }
 0x166   :  { %v765_v46 = vpop.f32.mrb[0].mxu1 }
 0x167   :  { %v767_v47 = vpop.f32.mrb[1].mxu1  ;;  %v766_v61 = vadd.f32 %v765_v46, %v227_v59  ;;  %v1918_v46 = vld [vmem:[#allocation7 + $0x78] sm:$0xff]  }
 0x168   :  { %v769_v48 = vpop.f32.mrb[2].mxu1  ;;  %v768_v62 = vadd.f32 %v767_v47, %v231_v60  ;;  %v1919_v47 = vld [vmem:[#allocation7 + $0x38] sm:$0xff]  }
 0x169   :  { %v771_v49 = vpop.f32.mrb[3].mxu1  ;;  %v770_v0 = vadd.f32 %v769_v48, %v227_v59  ;;  %v987_v48 = vld [vmem:[%s2154_s4] sm:$0x3] }
 0x16a   :  { %v772_v3 = vadd.f32 %v771_v49, %v231_v60  ;;  %v992_v49 = vrot.slane %v987_v48, %v226_v56 }
 0x16e   :  { %v775_v50 = vpop.f32.mrb[4].mxu1 }
 0x16f   :  { %v777_v51 = vpop.f32.mrb[5].mxu1  ;;  %v776_v11 = vadd.f32 %v775_v50, %v227_v59  ;;  %v996_v50 = vrot.slane %v987_v48, %v230_v58 }
 0x170   :  { %v779_v52 = vpop.f32.mrb[6].mxu1  ;;  %v778_v14 = vadd.f32 %v777_v51, %v231_v60 }
 0x171   :  { %v781_v53 = vpop.f32.mrb[7].mxu1  ;;  %v780_v19 = vadd.f32 %v779_v52, %v227_v59 }
 0x172   :  { %v782_v23 = vadd.f32 %v781_v53, %v231_v60 }
 0x1b0   :  { %v924_v63 = vpop.f32.mrb[0].mxu0 }
 0x1b1   :  { %v1667_v1 = vadd.f32 %v924_v63, %v766_v61  ;;  %v926_v2 = vpop.f32.mrb[1].mxu0 }
 0x1b2   :  { %v1669_v4 = vadd.f32 %v926_v2, %v768_v62  ;;  %v928_v5 = vpop.f32.mrb[2].mxu0 }
 0x1b3   :  { %v1671_v6 = vadd.f32 %v928_v5, %v770_v0  ;;  %v930_v7 = vpop.f32.mrb[3].mxu0  ;;  %v943_v9 = vmax.f32 %v1667_v1, 0.0 }
 0x1b4   :  { %v1673_v8 = vadd.f32 %v930_v7, %v772_v3  ;;  %v944_v12 = vmax.f32 %v1669_v4, 0.0 }
 0x1b5   :  { %v945_v10 = vmax.f32 %v1671_v6, 0.0 }
 0x1b6   :  { %v946_v13 = vmax.f32 %v1673_v8, 0.0 }
 0x1b7   :  { %v951_v15 = vpack.c.bf16 %v945_v10, %v943_v9 }
 0x1b8   :  { %v952_v16 = vpack.c.bf16 %v946_v13, %v944_v12  ;;  %v934_v17 = vpop.f32.mrb[4].mxu0 }
 0x1b9   :  { %v1675_v20 = vadd.f32 %v934_v17, %v776_v11  ;;  %v936_v21 = vpop.f32.mrb[5].mxu0 }
 0x1ba   :  { %v1677_v24 = vadd.f32 %v936_v21, %v778_v14  ;;  %v938_v25 = vpop.f32.mrb[6].mxu0  ;;  %1191 = vmatprep.mubr.bf16.mxu1 %v952_v16 }
 0x1bb   :  { %v1679_v26 = vadd.f32 %v938_v25, %v780_v19  ;;  %v940_v27 = vpop.f32.mrb[7].mxu0  ;;  %1192 = vmatmul.mubr.bf16.vlgmr.msra.gmra.mrb[8].mxu1 %v951_v15  ;;  %v947_v30 = vmax.f32 %v1675_v20, 0.0  ;;  %v1602_v19 = vld [vmem:[%s2156_s6] ss:$0 sm:$0xff] }
 0x1bc   :  { %v1681_v28 = vadd.f32 %v940_v27, %v782_v23  ;;  %1639 = vmatpush3.bf16.msra.mxu1 %v1905_v18  ;;  %v948_v33 = vmax.f32 %v1677_v24, 0.0 }
 0x1bd   :  { %v949_v31 = vmax.f32 %v1679_v26, 0.0  ;;  %1640 = vmatprep.subr.bf16.mxu1 %v1906_v22 }
 0x1be   :  { %v950_v34 = vmax.f32 %v1681_v28, 0.0 }
 0x1bf   :  { %v953_v35 = vpack.c.bf16 %v949_v31, %v947_v30 }
 0x1c0   :  { %v954_v36 = vpack.c.bf16 %v950_v34, %v948_v33  ;;  %1641 = vmatpush3.bf16.msra.mxu1 %v1907_v29 }
 0x1c1   :  { %1642 = vmatprep.subr.bf16.mxu1 %v1908_v32 }
 0x1c2   :  { %1201 = vmatprep.mubr.bf16.mxu1 %v954_v36 }
 0x1c3   :  { %1202 = vmatmul.mubr.bf16.gmra.mrb[12].mxu1 %v953_v35 }
 0x1c4   :  { %1643 = vmatpush3.bf16.msra.mxu1 %v1909_v37 }
 0x1c5   :  { %1644 = vmatprep.subr.bf16.mxu1 %v1910_v38 }
 0x1c8   :  { %1645 = vmatpush3.bf16.msra.mxu1 %v1911_v39 }
 0x1c9   :  { %1646 = vmatprep.subr.bf16.mxu1 %v1912_v40 }
 0x1cc   :  { %1647 = vmatpush3.bf16.msra.mxu1 %v1913_v41 }
 0x1cd   :  { %1648 = vmatprep.subr.bf16.mxu1 %v1914_v42 }
 0x1d0   :  { %1649 = vmatpush3.bf16.msra.mxu1 %v1915_v43 }
 0x1d1   :  { %1650 = vmatprep.subr.bf16.mxu1 %v1916_v44 }
 0x1d4   :  { %1651 = vmatpush3.bf16.msra.mxu1 %v1917_v45 }
 0x1d5   :  { %1652 = vmatprep.subr.bf16.mxu1 %v1918_v46 }
 0x1d8   :  { %1653 = vmatpush3.bf16.msra.mxu1 %v1919_v47 }
 0x28e   :  { %v1193_v51 = vpop.f32.mrb[8].mxu1 }
 0x28f   :  { %v1194_v52 = vadd.f32 %v1193_v51, %v992_v49  ;;  %v1195_v53 = vpop.f32.mrb[9].mxu1 }
 0x290   :  { %v1196_v54 = vadd.f32 %v1195_v53, %v996_v50  ;;  %v1197_v57 = vpop.f32.mrb[10].mxu1 }
 0x291   :  { %v1198_v59 = vadd.f32 %v1197_v57, %v992_v49  ;;  %v1199_v60 = vpop.f32.mrb[11].mxu1  ;;  %v1212_v62 = vmax.f32 %v1194_v52, 0.0 }
 0x292   :  { %v1200_v61 = vadd.f32 %v1199_v60, %v996_v50  ;;  %v1213_v0 = vmax.f32 %v1196_v54, 0.0 }
 0x293   :  { %v1214_v63 = vmax.f32 %v1198_v59, 0.0 }
 0x294   :  { %v1215_v1 = vmax.f32 %v1200_v61, 0.0 }
 0x295   :  { %v1220_v2 = vpack.c.bf16 %v1214_v63, %v1212_v62 }
 0x296   :  { %v1221_v3 = vpack.c.bf16 %v1215_v1, %v1213_v0  ;;  %v1203_v4 = vpop.f32.mrb[12].mxu1 }
 0x297   :  { %v1204_v5 = vadd.f32 %v1203_v4, %v992_v49  ;;  %v1205_v56 = vpop.f32.mrb[13].mxu1 }
 0x298   :  { %v1206_v6 = vadd.f32 %v1205_v56, %v996_v50  ;;  %v1207_v55 = vpop.f32.mrb[14].mxu1  ;;  %1391 = vmatprep.mubr.bf16.mxu1 %v1221_v3 }
 0x299   :  { %v1208_v58 = vadd.f32 %v1207_v55, %v992_v49  ;;  %v1209_v7 = vpop.f32.mrb[15].mxu1  ;;  %1392 = vmatmul.mubr.bf16.vlgmr.msra.gmra.mrb[16].mxu1 %v1220_v2  ;;  %v1216_v9 = vmax.f32 %v1204_v5, 0.0 }
 0x29a   :  { %v1210_v8 = vadd.f32 %v1209_v7, %v996_v50  ;;  %v1217_v11 = vmax.f32 %v1206_v6, 0.0 }
 0x29b   :  { %v1218_v10 = vmax.f32 %v1208_v58, 0.0 }
 0x29c   :  { %v1219_v12 = vmax.f32 %v1210_v8, 0.0 }
 0x29d   :  { %v1222_v13 = vpack.c.bf16 %v1218_v10, %v1216_v9 }
 0x29e   :  { %v1223_v14 = vpack.c.bf16 %v1219_v12, %v1217_v11 }
 0x2a0   :  { %1399 = vmatprep.mubr.bf16.mxu1 %v1223_v14 }
 0x2a1   :  { %1400 = vmatmul.mubr.bf16.gmra.mrb[20].mxu1 %v1222_v13 }
 0x36c   :  { %v1654_v15 = vpop.f32.mrb[16].mxu1 }
 0x36d   :  { %v1655_v16 = vpop.f32.mrb[17].mxu1 }
 0x36e   :  { %v1656_v17 = vadd.f32 %v1655_v16, %v1654_v15  ;;  %v1657_v18 = vpop.f32.mrb[18].mxu1 }
 0x36f   :  { %v1658_v20 = vpop.f32.mrb[19].mxu1 }
 0x370   :  { %v1659_v21 = vadd.f32 %v1658_v20, %v1657_v18  ;;  %v1394_v22 = vadd.f32 %v1656_v17, %v1602_v19 }
 0x372   :  { %v1397_v23 = vadd.f32 %v1659_v21, %v1602_v19 }
 0x374   :  { %v1630_v24 = vpack.c.bf16 %v1397_v23, %v1394_v22  ;;  %v1660_v25 = vpop.f32.mrb[20].mxu1 }
 0x375   :  { %v1661_v26 = vpop.f32.mrb[21].mxu1 }
 0x376   :  { %1631 = vst [vmem:[#allocation9] sm:$0xff] %v1630_v24   ;;  %v1663_v27 = vpop.f32.mrb[22].mxu1 }
 0x377   :  { %v1664_v28 = vpop.f32.mrb[23].mxu1 }
 0x37d   :  { %v1445_v29 = vld [vmem:[#allocation9] sm:$0xf] }
 0x37e   :  { %1446 = vst [vmem:[%s2157_s7] sm:$0xf] %v1445_v29 }
 0x37f   :  { %1463 = vsyncpa [#allocation3], 1 }
 0x380   :  { %1464 = vsyncpa [#allocation5], 1 }
 0x381   :  { %1465 = vsyncpa [#allocation8], 1 }

</bundles_post_ra>
